<compile_context>
chip_gen: v7x
topology: tpu7x:2x2x1
jax: 0.10.0
libtpu: 0.0.40
codegen_flags: <defaults>
</compile_context>

<pallas_src>
import jax
import jax.numpy as jnp
from jax.experimental import pallas as pl
from jax.experimental.pallas import tpu as pltpu

_LANE = 128      # f32 lane width
_SUBLANE = 8     # f32 sublane width


def _round_up(x, m):
    return ((x + m - 1) // m) * m


def make_decoder(latent_size, conditional_size, layer_sizes,
                 param_dtype=jnp.bfloat16):
    """Build (pack_params, forward) for the Decoder MLP.

    pack_params(weights, biases) -> (w_buf, b_buf)
        weights[i]: [in_i, out_i]  (transposed vs torch's [out, in])
        biases[i]:  [out_i]
        w_buf: one contiguous zero-padded buffer in `param_dtype`
        b_buf: small f32 bias buffer (one row per layer)

    forward(z, c, packed): full MLP in one pallas_call.
    """
    layer_sizes = list(layer_sizes)
    num_layers = len(layer_sizes)
    assert num_layers >= 1, "need at least one layer"
    assert conditional_size >= 0
    assert latent_size + conditional_size > 0, "need at least one input feature"

    input_size = latent_size + conditional_size
    in_sizes = [input_size] + layer_sizes[:-1]
    out_sizes = layer_sizes

    # Lane-dense padded feature dims.
    in_pads = [_round_up(s, _LANE) for s in in_sizes]
    out_pads = [_round_up(s, _LANE) for s in out_sizes]
    in_slab = in_pads[0]                 # merged z|c input slab width
    # NOTE: per-layer sub-rectangle packing (tighter than max(out_pads)) is
    # skipped: only matters when layer widths pad heterogeneously AND VMEM is
    # tight; here every layer pads to the same lane width anyway.
    buf_w = max(out_pads)

    # Static row offsets of each layer's weight block inside the packed buffer.
    w_offs, row = [], 0
    for ip in in_pads:
        w_offs.append(row)
        row += ip                        # multiples of 128 -> always 8/16 aligned
    total_rows = row
    bias_rows = _round_up(num_layers, _SUBLANE)
    w_itemsize = jnp.dtype(param_dtype).itemsize

    def pack_params(weights, biases):
        wbuf = jnp.zeros((total_rows, buf_w), jnp.float32)
        bbuf = jnp.zeros((bias_rows, buf_w), jnp.float32)
        for i in range(num_layers):
            w = jnp.asarray(weights[i], jnp.float32)
            b = jnp.asarray(biases[i], jnp.float32)
            wbuf = wbuf.at[w_offs[i]:w_offs[i] + in_sizes[i],
                           :out_sizes[i]].set(w)
            bbuf = bbuf.at[i, :out_sizes[i]].set(b)
        return wbuf.astype(param_dtype), bbuf

    def kernel(x_ref, w_ref, b_ref, o_ref):
        # Zero padding of inputs/weights/biases keeps ReLU(0)=0 and tanh(0)=0
        # in padded lanes, so the math is exact (in the f32 path).
        h = x_ref[...]
        for i in range(num_layers):
            w = w_ref[w_offs[i]:w_offs[i] + in_pads[i], :out_pads[i]]
            b = b_ref[i:i + 1, :out_pads[i]]            # f32 bias row
            h = jnp.dot(h.astype(param_dtype), w,
                        preferred_element_type=jnp.float32) + b
            h = jnp.maximum(h, 0.0) if i + 1 < num_layers else jnp.tanh(h)
        o_ref[...] = h

    def _build_pallas_forward(single_buffer_params):
        # Constant-index params block never changes across the batch grid ->
        # single-buffer it (halves its VMEM footprint; matters on v7x 64 MiB).
        param_spec_kwargs = (dict(pipeline_mode=pl.Buffered(1))
                             if single_buffer_params else {})

        @jax.jit
        def fwd(x_p, w_buf, b_buf):
            b_pad = x_p.shape[0]
            # >=512 rows: 256-row tiles fill the 256-wide v6e/v7x MXU and give
            # a >=2-step parallel grid (both v7x TCs). Small batches: 1 step.
            tile_b = 256 if b_pad >= 512 else b_pad
            grid = b_pad // tile_b

            need = (2 * total_rows * buf_w * w_itemsize   # params (<=2 bufs)
                    + 2 * bias_rows * buf_w * 4           # biases
                    + 2 * tile_b * in_slab * 4            # input double buffer
                    + 2 * tile_b * out_pads[-1] * 4       # output double buffer
                    + 2 * tile_b * buf_w * 4)             # live activations
            vmem_limit = int(min(max(need * 13 // 10, 16 << 20), 64 << 20))

            flops = 2 * b_pad * sum(ip * op for ip, op in zip(in_pads, out_pads))
            trans = b_pad * out_pads[-1]                  # final tanh
            bytes_acc = (b_pad * in_slab * 4
                         + total_rows * buf_w * w_itemsize
                         + bias_rows * buf_w * 4
                         + b_pad * out_pads[-1] * 4)

            return pl.pallas_call(
                kernel,
                out_shape=jax.ShapeDtypeStruct((b_pad, out_pads[-1]),
                                               jnp.float32),
                grid_spec=pltpu.PrefetchScalarGridSpec(
                    num_scalar_prefetch=0,
                    grid=(grid,),
                    in_specs=[
                        pl.BlockSpec((tile_b, in_slab), lambda i: (i, 0)),
                        pl.BlockSpec((total_rows, buf_w), lambda i: (0, 0),
                                     **param_spec_kwargs),
                        pl.BlockSpec((bias_rows, buf_w), lambda i: (0, 0),
                                     **param_spec_kwargs),
                    ],
                    out_specs=pl.BlockSpec((tile_b, out_pads[-1]),
                                           lambda i: (i, 0)),
                ),
                compiler_params=pltpu.CompilerParams(
                    dimension_semantics=("parallel",),
                    vmem_limit_bytes=vmem_limit),
                cost_estimate=pl.CostEstimate(
                    flops=int(flops), transcendentals=int(trans),
                    bytes_accessed=int(bytes_acc)),
            )(x_p, w_buf, b_buf)

        return fwd

    impl = []   # lazily chosen [jitted pallas forward]

    def forward(z, c, packed):
        w_buf, b_buf = packed
        z = jnp.asarray(z, jnp.float32)
        if conditional_size > 0:
            assert c is not None, "decoder was built with conditional_size > 0"
            x = jnp.concatenate((z, jnp.asarray(c, jnp.float32)), axis=-1)
        else:
            x = z
        batch = x.shape[0]
        # Bucket the padded batch to powers of two -> bounded Mosaic recompiles.
        b_pad = max(_SUBLANE, pl.next_power_of_2(batch))
        x_p = jnp.pad(x, ((0, b_pad - batch), (0, in_slab - input_size)))

        if not impl:
            err = None
            for single_buffered in (True, False):
                try:
                    fn = _build_pallas_forward(single_buffered)
                    out = fn(x_p, w_buf, b_buf)
                    impl.append(fn)
                    break
                except Exception as e:   # pl.Buffered(1) unsupported -> default
                    err = e
            else:
                raise err
        else:
            out = impl[0](x_p, w_buf, b_buf)

        # Strip batch / lane padding (cheap slice).
        return out[:batch, :out_sizes[-1]]

    return pack_params, forward


def init_decoder_params(key, latent_size, conditional_size, layer_sizes):
    """nn.Linear-style U(-1/sqrt(fan_in), 1/sqrt(fan_in)) init.

    Returns (weights, biases) with weights[i]: [in_i, out_i], biases[i]: [out_i].
    """
    weights, biases = [], []
    in_size = latent_size + conditional_size
    for out_size in layer_sizes:
        key, kw, kb = jax.random.split(key, 3)
        bound = 1.0 / float(in_size) ** 0.5
        weights.append(jax.random.uniform(kw, (in_size, out_size),
                                          jnp.float32, -bound, bound))
        biases.append(jax.random.uniform(kb, (out_size,),
                                         jnp.float32, -bound, bound))
        in_size = out_size
    return weights, biases


def _reference_forward(z, c, weights, biases):
    """Pure-JAX reference (mirrors the PyTorch Decoder.forward)."""
    x = jnp.concatenate((z, c), axis=-1) if c is not None else z
    n = len(weights)
    for i in range(n):
        x = x @ weights[i] + biases[i]
        x = jnp.maximum(x, 0.0) if i + 1 < n else jnp.tanh(x)
    return x


if __name__ == "__main__":
    latent_size = 8
    conditional_size = 8
    layer_sizes = [32, 64, 16]
    batch = 4

    root = jax.random.PRNGKey(0)
    k_z, k_c, k_p = jax.random.split(root, 3)

    z = jax.random.normal(k_z, (batch, latent_size), jnp.float32)
    c = jax.random.normal(k_c, (batch, conditional_size), jnp.float32)
    weights, biases = init_decoder_params(k_p, latent_size, conditional_size,
                                          layer_sizes)
    ref = _reference_forward(z, c, weights, biases)

    # Fast path: bf16 MXU weights (native on v5e/v6e/v7x), f32 accum + f32 bias.
    pack_bf16, fwd_bf16 = make_decoder(latent_size, conditional_size,
                                       layer_sizes, param_dtype=jnp.bfloat16)
    out_bf16 = jax.block_until_ready(fwd_bf16(z, c, pack_bf16(weights, biases)))
    assert out_bf16.shape == (batch, layer_sizes[-1])
    assert jnp.allclose(out_bf16, ref, atol=5e-2, rtol=5e-2), \
        "Pallas bf16 output mismatch"

    # Exactness check: f32 weight mode must match the pure-JAX reference tightly.
    pack_f32, fwd_f32 = make_decoder(latent_size, conditional_size,
                                     layer_sizes, param_dtype=jnp.float32)
    out_f32 = jax.block_until_ready(fwd_f32(z, c, pack_f32(weights, biases)))
    assert jnp.allclose(out_f32, ref, atol=1e-4, rtol=1e-4), \
        "Pallas f32 output mismatch"

    print("KERNEL_OK")
</pallas_src>

<mosaic_0001>
module attributes {stable_mosaic.version = 11 : i64} {
  func.func @kernel(%arg0: i32, %arg1: memref<8x128xf32, #tpu.memory_space<vmem>>, %arg2: memref<384x128xbf16, #tpu.memory_space<vmem>>, %arg3: memref<8x128xf32, #tpu.memory_space<vmem>>, %arg4: memref<8x128xf32, #tpu.memory_space<vmem>>) attributes {dimension_semantics = [#tpu.dimension_semantics<parallel>], iteration_bounds = array<i64: 1>, scalar_prefetch = 0 : i64, scratch_operands = 0 : i64, tpu.core_type = #tpu.core_type<tc>, window_params = [{transform_indices = @transform_0, window_bounds = array<i64: 8, 128>}, {pipeline_mode = #tpu.pipeline_mode<synchronous>, transform_indices = @transform_1, window_bounds = array<i64: 384, 128>}, {pipeline_mode = #tpu.pipeline_mode<synchronous>, transform_indices = @transform_2, window_bounds = array<i64: 8, 128>}, {transform_indices = @transform_3, window_bounds = array<i64: 8, 128>}]} {
    %c0 = arith.constant 0 : index
    %c0_0 = arith.constant 0 : index
    %0 = vector.load %arg1[%c0, %c0_0] : memref<8x128xf32, #tpu.memory_space<vmem>>, vector<8x128xf32>
    %c0_1 = arith.constant 0 : index
    %c0_2 = arith.constant 0 : index
    %1 = vector.load %arg2[%c0_1, %c0_2] : memref<384x128xbf16, #tpu.memory_space<vmem>>, vector<128x128xbf16>
    %c0_3 = arith.constant 0 : index
    %c0_4 = arith.constant 0 : index
    %2 = vector.load %arg3[%c0_3, %c0_4] : memref<8x128xf32, #tpu.memory_space<vmem>>, vector<1x128xf32>
    %3 = arith.truncf %0 : vector<8x128xf32> to vector<8x128xbf16>
    %cst = arith.constant dense<0.000000e+00> : vector<8x128xf32>
    %4 = tpu.matmul %3, %1, %cst {dimension_numbers = #tpu.dot_dimension_numbers<[1], [0], [0], [1], [0, 0, 1, 1], [], []>} : vector<8x128xbf16>, vector<128x128xbf16>, vector<8x128xf32> -> vector<8x128xf32>
    %5 = vector.broadcast %2 : vector<1x128xf32> to vector<8x128xf32>
    %6 = arith.addf %4, %5 : vector<8x128xf32>
    %cst_5 = arith.constant 0.000000e+00 : f32
    %7 = vector.broadcast %cst_5 : f32 to vector<8x128xf32>
    %8 = arith.maximumf %6, %7 : vector<8x128xf32>
    %c128 = arith.constant 128 : index
    %c0_6 = arith.constant 0 : index
    %9 = vector.load %arg2[%c128, %c0_6] : memref<384x128xbf16, #tpu.memory_space<vmem>>, vector<128x128xbf16>
    %c1 = arith.constant 1 : index
    %c0_7 = arith.constant 0 : index
    %10 = vector.load %arg3[%c1, %c0_7] : memref<8x128xf32, #tpu.memory_space<vmem>>, vector<1x128xf32>
    %11 = arith.truncf %8 : vector<8x128xf32> to vector<8x128xbf16>
    %cst_8 = arith.constant dense<0.000000e+00> : vector<8x128xf32>
    %12 = tpu.matmul %11, %9, %cst_8 {dimension_numbers = #tpu.dot_dimension_numbers<[1], [0], [0], [1], [0, 0, 1, 1], [], []>} : vector<8x128xbf16>, vector<128x128xbf16>, vector<8x128xf32> -> vector<8x128xf32>
    %13 = vector.broadcast %10 : vector<1x128xf32> to vector<8x128xf32>
    %14 = arith.addf %12, %13 : vector<8x128xf32>
    %cst_9 = arith.constant 0.000000e+00 : f32
    %15 = vector.broadcast %cst_9 : f32 to vector<8x128xf32>
    %16 = arith.maximumf %14, %15 : vector<8x128xf32>
    %c256 = arith.constant 256 : index
    %c0_10 = arith.constant 0 : index
    %17 = vector.load %arg2[%c256, %c0_10] : memref<384x128xbf16, #tpu.memory_space<vmem>>, vector<128x128xbf16>
    %c2 = arith.constant 2 : index
    %c0_11 = arith.constant 0 : index
    %18 = vector.load %arg3[%c2, %c0_11] : memref<8x128xf32, #tpu.memory_space<vmem>>, vector<1x128xf32>
    %19 = arith.truncf %16 : vector<8x128xf32> to vector<8x128xbf16>
    %cst_12 = arith.constant dense<0.000000e+00> : vector<8x128xf32>
    %20 = tpu.matmul %19, %17, %cst_12 {dimension_numbers = #tpu.dot_dimension_numbers<[1], [0], [0], [1], [0, 0, 1, 1], [], []>} : vector<8x128xbf16>, vector<128x128xbf16>, vector<8x128xf32> -> vector<8x128xf32>
    %21 = vector.broadcast %18 : vector<1x128xf32> to vector<8x128xf32>
    %22 = arith.addf %20, %21 : vector<8x128xf32>
    %23 = math.tanh %22 : vector<8x128xf32>
    %c0_13 = arith.constant 0 : index
    %c0_14 = arith.constant 0 : index
    %24 = vector.load %arg4[%c0_13, %c0_14] : memref<8x128xf32, #tpu.memory_space<vmem>>, vector<8x128xf32>
    tpu.vector_store %arg4[%c0_13, %c0_14], %23 {strides = array<i32>} : memref<8x128xf32, #tpu.memory_space<vmem>>, vector<8x128xf32>,
    return
  }
  func.func @transform_0(%arg0: i32) -> (i32, i32) {
    %c0_i32 = arith.constant 0 : i32
    %c0_i32_0 = arith.constant 0 : i32
    return %arg0, %c0_i32 : i32, i32
  }
  func.func @transform_1(%arg0: i32) -> (i32, i32) {
    %c0_i32 = arith.constant 0 : i32
    %c0_i32_0 = arith.constant 0 : i32
    %c0_i32_1 = arith.constant 0 : i32
    return %c0_i32, %c0_i32_0 : i32, i32
  }
  func.func @transform_2(%arg0: i32) -> (i32, i32) {
    %c0_i32 = arith.constant 0 : i32
    %c0_i32_0 = arith.constant 0 : i32
    %c0_i32_1 = arith.constant 0 : i32
    return %c0_i32, %c0_i32_0 : i32, i32
  }
  func.func @transform_3(%arg0: i32) -> (i32, i32) {
    %c0_i32 = arith.constant 0 : i32
    %c0_i32_0 = arith.constant 0 : i32
    return %arg0, %c0_i32 : i32, i32
  }
}

module attributes {stable_mosaic.version = 11 : i64} {
  func.func @kernel(%arg0: i32, %arg1: memref<8x128xf32, #tpu.memory_space<vmem>>, %arg2: memref<384x128xbf16, #tpu.memory_space<vmem>>, %arg3: memref<8x128xf32, #tpu.memory_space<vmem>>, %arg4: memref<8x128xf32, #tpu.memory_space<vmem>>) attributes {dimension_semantics = [#tpu.dimension_semantics<parallel>], iteration_bounds = array<i64: 1>, scalar_prefetch = 0 : i64, scratch_operands = 0 : i64, tpu.core_type = #tpu.core_type<tc>, window_params = [{transform_indices = @transform_0, window_bounds = array<i64: 8, 128>}, {pipeline_mode = #tpu.pipeline_mode<synchronous>, transform_indices = @transform_1, window_bounds = array<i64: 384, 128>}, {pipeline_mode = #tpu.pipeline_mode<synchronous>, transform_indices = @transform_2, window_bounds = array<i64: 8, 128>}, {transform_indices = @transform_3, window_bounds = array<i64: 8, 128>}]} {
    %c0 = arith.constant 0 : index
    %c0_0 = arith.constant 0 : index
    %0 = vector.load %arg1[%c0, %c0_0] : memref<8x128xf32, #tpu.memory_space<vmem>>, vector<8x128xf32>
    %c0_1 = arith.constant 0 : index
    %c0_2 = arith.constant 0 : index
    %1 = vector.load %arg2[%c0_1, %c0_2] : memref<384x128xbf16, #tpu.memory_space<vmem>>, vector<128x128xbf16>
    %c0_3 = arith.constant 0 : index
    %c0_4 = arith.constant 0 : index
    %2 = vector.load %arg3[%c0_3, %c0_4] : memref<8x128xf32, #tpu.memory_space<vmem>>, vector<1x128xf32>
    %3 = arith.truncf %0 : vector<8x128xf32> to vector<8x128xbf16>
    %cst = arith.constant dense<0.000000e+00> : vector<8x128xf32>
    %4 = tpu.matmul %3, %1, %cst {dimension_numbers = #tpu.dot_dimension_numbers<[1], [0], [0], [1], [0, 0, 1, 1], [], []>} : vector<8x128xbf16>, vector<128x128xbf16>, vector<8x128xf32> -> vector<8x128xf32>
    %5 = vector.broadcast %2 : vector<1x128xf32> to vector<8x128xf32>
    %6 = arith.addf %4, %5 : vector<8x128xf32>
    %cst_5 = arith.constant 0.000000e+00 : f32
    %7 = vector.broadcast %cst_5 : f32 to vector<8x128xf32>
    %8 = arith.maximumf %6, %7 : vector<8x128xf32>
    %c128 = arith.constant 128 : index
    %c0_6 = arith.constant 0 : index
    %9 = vector.load %arg2[%c128, %c0_6] : memref<384x128xbf16, #tpu.memory_space<vmem>>, vector<128x128xbf16>
    %c1 = arith.constant 1 : index
    %c0_7 = arith.constant 0 : index
    %10 = vector.load %arg3[%c1, %c0_7] : memref<8x128xf32, #tpu.memory_space<vmem>>, vector<1x128xf32>
    %11 = arith.truncf %8 : vector<8x128xf32> to vector<8x128xbf16>
    %cst_8 = arith.constant dense<0.000000e+00> : vector<8x128xf32>
    %12 = tpu.matmul %11, %9, %cst_8 {dimension_numbers = #tpu.dot_dimension_numbers<[1], [0], [0], [1], [0, 0, 1, 1], [], []>} : vector<8x128xbf16>, vector<128x128xbf16>, vector<8x128xf32> -> vector<8x128xf32>
    %13 = vector.broadcast %10 : vector<1x128xf32> to vector<8x128xf32>
    %14 = arith.addf %12, %13 : vector<8x128xf32>
    %cst_9 = arith.constant 0.000000e+00 : f32
    %15 = vector.broadcast %cst_9 : f32 to vector<8x128xf32>
    %16 = arith.maximumf %14, %15 : vector<8x128xf32>
    %c256 = arith.constant 256 : index
    %c0_10 = arith.constant 0 : index
    %17 = vector.load %arg2[%c256, %c0_10] : memref<384x128xbf16, #tpu.memory_space<vmem>>, vector<128x128xbf16>
    %c2 = arith.constant 2 : index
    %c0_11 = arith.constant 0 : index
    %18 = vector.load %arg3[%c2, %c0_11] : memref<8x128xf32, #tpu.memory_space<vmem>>, vector<1x128xf32>
    %19 = arith.truncf %16 : vector<8x128xf32> to vector<8x128xbf16>
    %cst_12 = arith.constant dense<0.000000e+00> : vector<8x128xf32>
    %20 = tpu.matmul %19, %17, %cst_12 {dimension_numbers = #tpu.dot_dimension_numbers<[1], [0], [0], [1], [0, 0, 1, 1], [], []>} : vector<8x128xbf16>, vector<128x128xbf16>, vector<8x128xf32> -> vector<8x128xf32>
    %21 = vector.broadcast %18 : vector<1x128xf32> to vector<8x128xf32>
    %22 = arith.addf %20, %21 : vector<8x128xf32>
    %23 = math.tanh %22 : vector<8x128xf32>
    %c0_13 = arith.constant 0 : index
    %c0_14 = arith.constant 0 : index
    %24 = vector.load %arg4[%c0_13, %c0_14] : memref<8x128xf32, #tpu.memory_space<vmem>>, vector<8x128xf32>
    tpu.vector_store %arg4[%c0_13, %c0_14], %23 {strides = array<i32>} : memref<8x128xf32, #tpu.memory_space<vmem>>, vector<8x128xf32>,
    return
  }
  func.func @transform_0(%arg0: i32) -> (i32, i32) {
    %c0_i32 = arith.constant 0 : i32
    %c0_i32_0 = arith.constant 0 : i32
    return %arg0, %c0_i32 : i32, i32
  }
  func.func @transform_1(%arg0: i32) -> (i32, i32) {
    %c0_i32 = arith.constant 0 : i32
    %c0_i32_0 = arith.constant 0 : i32
    %c0_i32_1 = arith.constant 0 : i32
    return %c0_i32, %c0_i32_0 : i32, i32
  }
  func.func @transform_2(%arg0: i32) -> (i32, i32) {
    %c0_i32 = arith.constant 0 : i32
    %c0_i32_0 = arith.constant 0 : i32
    %c0_i32_1 = arith.constant 0 : i32
    return %c0_i32, %c0_i32_0 : i32, i32
  }
  func.func @transform_3(%arg0: i32) -> (i32, i32) {
    %c0_i32 = arith.constant 0 : i32
    %c0_i32_0 = arith.constant 0 : i32
    return %arg0, %c0_i32 : i32, i32
  }
}

</mosaic_0001>

<bundles_post_ra>
// kernel: fwd.1
= control target key start
LH: loop header
LB: loop body
LE: loop exit
PB: predicated region body
PF: predicated region fallthrough
CT: control target
= control target key end

     0   :  { %8 = vsyncpa [#allocation3], 0  ;;  %s752_s0 = inlined_call_operand.hbm [shape: f32[8,128], index: 0, kind: input, shape index: {}]   ;;  %s753_s1 = inlined_call_operand.hbm [shape: bf16[384,128], index: 1, kind: input, shape index: {}]   ;;  %s754_s2 = inlined_call_operand.hbm [shape: f32[8,128], index: 2, kind: input, shape index: {}]   ;;  %s755_s3 = inlined_call_operand.hbm [shape: f32[8,128], index: 3, kind: output, shape index: {}]  }
   0x1   :  { %9 = vsyncpa [#allocation6], 0 }
   0x2   :  { %10 = vsyncpa [#allocation4], 0  ;;  %s646_s12 = smov [#allocation5]   ;;  %s552_s16 = scalar_lea.hbm %s753_s1, 3072 }
   0x3   :  { %s26_s13 = sshll.u32 %s646_s12, 4  ;;  %p553_p0 = scmp.ne.s32.totalorder %s753_s1, %s552_s16  ;;  %s27_s13 = int_to_ptr.vmem [resolvable:$true] %s26_s13 }
   0x4   :  { %p556_p1 = scmp.lt.u32.totalorder %s552_s16, %s753_s1 }
   0x6   :  { %p558_p2 = pnand %p556_p1, %p553_p0 }
   0x8   :  { %561 = shalt.err (!%p558_p2)
}
   0x9   :  { %s562_s21 = scalar_lea.vmem %s27_s13, 3072  ;;  %p567_p4 = scmp.lt.s32.totalorder %s27_s13, %s27_s13 }
   0xa   :  { %p563_p3 = scmp.ne.s32.totalorder %s27_s13, %s562_s21  ;;  %p568_p5 = scmp.lt.s32.totalorder %s562_s21, %s562_s21 }
   0xc   :  { %p569_p6 = por %p568_p5, %p567_p4 }
   0xe   :  { %p570_p7 = pnand %p569_p6, %p563_p3 }
  0x10   :  { %573 = shalt.err (!%p570_p7)
}
  0x11   :  { %s647_s22 = smov 64   ;;  %s648_s23 = smov 4  }
  0x12   :  { %32 = dma.hbm_to_vmem [thread:$0]  %s753_s1, 3072, %s27_s13, [#allocation6], %s647_s22, %s647_s22, %s648_s23  }
  0x13   :  { %s649_s26 = smov [#allocation2]   ;;  %s650_s28 = smov [#allocation7]  }
  0x14   :  { %s17_s27 = sshll.u32 %s649_s26, 4  ;;  %s39_s29 = sshll.u32 %s650_s28, 4  ;;  %s18_s27 = int_to_ptr.vmem [resolvable:$true] %s17_s27  ;;  %s40_s29 = int_to_ptr.vmem [resolvable:$true] %s39_s29 }
  0x15   :  { %s574_s5 = scalar_lea.hbm %s752_s0, 128 }
  0x16   :  { %p575_p8 = scmp.ne.s32.totalorder %s752_s0, %s574_s5  ;;  %p578_p9 = scmp.lt.u32.totalorder %s574_s5, %s752_s0 }
  0x18   :  { %p580_p10 = pnand %p578_p9, %p575_p8 }
  0x1a   :  { %583 = shalt.err (!%p580_p10)
}
  0x1b   :  { %s584_s1 = scalar_lea.vmem %s18_s27, 128  ;;  %p589_p12 = scmp.lt.s32.totalorder %s18_s27, %s18_s27 }
  0x1c   :  { %p585_p11 = scmp.ne.s32.totalorder %s18_s27, %s584_s1  ;;  %p590_p13 = scmp.lt.s32.totalorder %s584_s1, %s584_s1 }
  0x1e   :  { %p591_p0 = por %p590_p13, %p589_p12 }
  0x20   :  { %p592_p1 = pnand %p591_p0, %p585_p11 }
  0x22   :  { %595 = shalt.err (!%p592_p1)
}
  0x23   :  { %20 = dma.hbm_to_vmem [thread:$0]  %s752_s0, 128, %s18_s27, [#allocation3]  }
  0x24   :  { %s596_s14 = scalar_lea.hbm %s754_s2, 128 }
  0x25   :  { %p597_p2 = scmp.ne.s32.totalorder %s754_s2, %s596_s14  ;;  %p600_p3 = scmp.lt.u32.totalorder %s596_s14, %s754_s2 }
  0x27   :  { %p602_p4 = pnand %p600_p3, %p597_p2 }
  0x29   :  { %605 = shalt.err (!%p602_p4)
}
  0x2a   :  { %s606_s19 = scalar_lea.vmem %s40_s29, 128  ;;  %p611_p6 = scmp.lt.s32.totalorder %s40_s29, %s40_s29 }
  0x2b   :  { %p607_p5 = scmp.ne.s32.totalorder %s40_s29, %s606_s19  ;;  %p612_p7 = scmp.lt.s32.totalorder %s606_s19, %s606_s19 }
  0x2d   :  { %p613_p8 = por %p612_p7, %p611_p6 }
  0x2f   :  { %p614_p9 = pnand %p613_p8, %p607_p5 }
  0x31   :  { %617 = shalt.err (!%p614_p9)
}
  0x32   :  { %42 = dma.hbm_to_vmem [thread:$0]  %s754_s2, 128, %s40_s29, [#allocation6]  }
  0x33   :  { %640 = dma.done.wait [#allocation3], 128  }
  0x34   :  { %641 = vsyncadd [#allocation3], 4294967168 }
  0x35   :  { %642 = dma.done.wait [#allocation6], 3200  }
  0x36   :  { %643 = vsyncadd [#allocation6], 4294964096  ;;  %v651_v0 = vmov 0.0   ;;  %vm652_vm0 = vmmov 0   ;;  %v526_v1 = vld [vmem:[#allocation5] sm:$0xff]   ;;  %v527_v2 = vld [vmem:[#allocation5 + $0x8] sm:$0xff]  }
  0x37   :  { %458 = vmatprep.subr.bf16.mxu0 %v651_v0  ;;  %474 = vmatprep.mubr.msk.bf16.mxu0 %vm652_vm0, %v651_v0  ;;  %v528_v3 = vld [vmem:[#allocation5 + $0x10] sm:$0xff]   ;;  %v534_v4 = vld [vmem:[#allocation5 + $0x40] sm:$0xff]   ;;  %v529_v5 = vld [vmem:[#allocation5 + $0x18] sm:$0xff]   ;;  %s653_s2 = smov [#allocation8]  }
  0x38   :  { %478 = vmatprep.subr.bf16.mxu1 %v651_v0  ;;  %494 = vmatprep.mubr.msk.bf16.mxu1 %vm652_vm0, %v651_v0  ;;  %v535_v6 = vld [vmem:[#allocation5 + $0x48] sm:$0xff]   ;;  %v530_v7 = vld [vmem:[#allocation5 + $0x20] sm:$0xff]   ;;  %v536_v8 = vld [vmem:[#allocation5 + $0x50] sm:$0xff]   ;;  %s394_s21 = sshll.u32 %s653_s2, 4  ;;  %s395_s21 = int_to_ptr.vmem [resolvable:$true] %s394_s21 }
  0x39   :  { %459 = vmatpush3.bf16.msra.mxu0 %v526_v1  ;;  %479 = vmatpush3.bf16.msra.mxu1 %v534_v4  ;;  %v531_v9 = vld [vmem:[#allocation5 + $0x28] sm:$0xff]   ;;  %v537_v10 = vld [vmem:[#allocation5 + $0x58] sm:$0xff]   ;;  %v532_v11 = vld [vmem:[#allocation5 + $0x30] sm:$0xff]   ;;  %s618_s22 = scalar_lea.vmem %s395_s21, 128  ;;  %p623_p11 = scmp.lt.s32.totalorder %s395_s21, %s395_s21 }
  0x3a   :  { %460 = vmatprep.subr.bf16.mxu0 %v651_v0  ;;  %480 = vmatprep.subr.bf16.mxu1 %v651_v0  ;;  %v538_v12 = vld [vmem:[#allocation5 + $0x60] sm:$0xff]   ;;  %v533_v13 = vld [vmem:[#allocation5 + $0x38] sm:$0xff]   ;;  %v539_v15 = vld [vmem:[#allocation5 + $0x68] sm:$0xff]   ;;  %p619_p10 = scmp.ne.s32.totalorder %s395_s21, %s618_s22  ;;  %p624_p12 = scmp.lt.s32.totalorder %s618_s22, %s618_s22 }
  0x3b   :  { %v53_v14 = vld [vmem:[#allocation2] sm:$0xff]  ;;  %v540_v17 = vld [vmem:[#allocation5 + $0x70] sm:$0xff]   ;;  %v542_v19 = vld [vmem:[#allocation5 + $0x80] sm:$0xff]  }
  0x3c   :  { %v71_v16 = vpack.c.bf16 %v53_v14, %v53_v14  ;;  %v541_v18 = vld [vmem:[#allocation5 + $0x78] sm:$0xff]   ;;  %v543_v20 = vld [vmem:[#allocation5 + $0x88] sm:$0xff]   ;;  %v544_v21 = vld [vmem:[#allocation5 + $0x90] sm:$0xff]   ;;  %p625_p13 = por %p624_p12, %p623_p11 }
  0x3d   :  { %461 = vmatpush3.bf16.msra.mxu0 %v527_v2  ;;  %481 = vmatpush3.bf16.msra.mxu1 %v535_v6  ;;  %v545_v22 = vld [vmem:[#allocation5 + $0x98] sm:$0xff]   ;;  %v546_v23 = vld [vmem:[#allocation5 + $0xa0] sm:$0xff]   ;;  %v547_v24 = vld [vmem:[#allocation5 + $0xa8] sm:$0xff]  }
  0x3e   :  { %462 = vmatprep.subr.bf16.mxu0 %v651_v0  ;;  %482 = vmatprep.subr.bf16.mxu1 %v651_v0  ;;  %v404_v25 = vld [vmem:[#allocation7] ss:$0 sm:$0xff]  ;;  %v548_v33 = vld [vmem:[#allocation5 + $0xb0] sm:$0xff]   ;;  %v549_v34 = vld [vmem:[#allocation5 + $0xb8] sm:$0xff]   ;;  %p626_p0 = pnand %p625_p13, %p619_p10 }
  0x3f   :  { %v413_v35 = vld [vmem:[#allocation7 + $0x1] ss:$0 sm:$0xff]  ;;  %v422_v43 = vld [vmem:[#allocation7 + $0x2] ss:$0 sm:$0xff] }
  0x41   :  { %463 = vmatpush3.bf16.msra.mxu0 %v528_v3  ;;  %483 = vmatpush3.bf16.msra.mxu1 %v536_v8 }
  0x42   :  { %464 = vmatprep.subr.bf16.mxu0 %v651_v0  ;;  %484 = vmatprep.subr.bf16.mxu1 %v651_v0 }
  0x45   :  { %465 = vmatpush3.bf16.msra.mxu0 %v529_v5  ;;  %485 = vmatpush3.bf16.msra.mxu1 %v537_v10 }
  0x46   :  { %466 = vmatprep.subr.bf16.mxu0 %v651_v0  ;;  %486 = vmatprep.subr.bf16.mxu1 %v651_v0 }
  0x49   :  { %467 = vmatpush3.bf16.msra.mxu0 %v530_v7  ;;  %487 = vmatpush3.bf16.msra.mxu1 %v538_v12 }
  0x4a   :  { %468 = vmatprep.subr.bf16.mxu0 %v651_v0  ;;  %488 = vmatprep.subr.bf16.mxu1 %v651_v0 }
  0x4d   :  { %469 = vmatpush3.bf16.msra.mxu0 %v531_v9  ;;  %489 = vmatpush3.bf16.msra.mxu1 %v539_v15 }
  0x4e   :  { %470 = vmatprep.subr.bf16.mxu0 %v651_v0  ;;  %490 = vmatprep.subr.bf16.mxu1 %v651_v0 }
  0x51   :  { %471 = vmatpush3.bf16.msra.mxu0 %v532_v11  ;;  %491 = vmatpush3.bf16.msra.mxu1 %v540_v17 }
  0x52   :  { %472 = vmatprep.subr.bf16.mxu0 %v651_v0  ;;  %492 = vmatprep.subr.bf16.mxu1 %v651_v0 }
  0x55   :  { %473 = vmatpush3.bf16.msra.mxu0 %v533_v13  ;;  %493 = vmatpush3.bf16.msra.mxu1 %v541_v18 }
  0x56   :  { %498 = vmatprep.subr.bf16.mxu0 %v651_v0 }
  0x58   :  { %475 = vmatmul.mubr.bf16.vlgmr.msra.gmra.mrb[0].mxu0 %v71_v16 }
  0x59   :  { %514 = vmatprep.mubr.msk.bf16.mxu0 %vm652_vm0, %v651_v0  ;;  %499 = vmatpush3.bf16.msra.mxu0 %v542_v19 }
  0x5a   :  { %500 = vmatprep.subr.bf16.mxu0 %v651_v0 }
  0x5d   :  { %501 = vmatpush3.bf16.msra.mxu0 %v543_v20 }
  0x5e   :  { %502 = vmatprep.subr.bf16.mxu0 %v651_v0 }
  0x61   :  { %503 = vmatpush3.bf16.msra.mxu0 %v544_v21 }
  0x62   :  { %504 = vmatprep.subr.bf16.mxu0 %v651_v0 }
  0x65   :  { %505 = vmatpush3.bf16.msra.mxu0 %v545_v22 }
  0x66   :  { %506 = vmatprep.subr.bf16.mxu0 %v651_v0 }
  0x69   :  { %507 = vmatpush3.bf16.msra.mxu0 %v546_v23 }
  0x6a   :  { %508 = vmatprep.subr.bf16.mxu0 %v651_v0 }
  0x6d   :  { %509 = vmatpush3.bf16.msra.mxu0 %v547_v24 }
  0x6e   :  { %510 = vmatprep.subr.bf16.mxu0 %v651_v0 }
  0x71   :  { %511 = vmatpush3.bf16.msra.mxu0 %v548_v33 }
  0x72   :  { %512 = vmatprep.subr.bf16.mxu0 %v651_v0 }
  0x75   :  { %513 = vmatpush3.bf16.msra.mxu0 %v549_v34 }
 0x12b   :  { %v158_v26 = vpop.f32.mrb[0].mxu0 }
 0x12c   :  { %v159_v27 = vadd.f32 %v404_v25, %v158_v26  ;;  %v476_v28 = vpop.f32.mrb[1].mxu0 }
 0x12d   :  { %v161_v29 = vpop.f32.mrb[2].mxu0 }
 0x12e   :  { %v164_v30 = vmax.f32 %v159_v27, 0.0  ;;  %v477_v31 = vpop.f32.mrb[3].mxu0 }
 0x130   :  { %v182_v32 = vpack.c.bf16 %v164_v30, %v164_v30 }
 0x132   :  { %495 = vmatmul.mubr.bf16.vlgmr.msra.gmra.mrb[0].mxu1 %v182_v32 }
 0x205   :  { %v269_v36 = vpop.f32.mrb[0].mxu1 }
 0x206   :  { %v270_v37 = vadd.f32 %v413_v35, %v269_v36  ;;  %v496_v38 = vpop.f32.mrb[1].mxu1 }
 0x207   :  { %v272_v39 = vpop.f32.mrb[2].mxu1 }
 0x208   :  { %v275_v40 = vmax.f32 %v270_v37, 0.0  ;;  %v497_v41 = vpop.f32.mrb[3].mxu1 }
 0x20a   :  { %v293_v42 = vpack.c.bf16 %v275_v40, %v275_v40 }
 0x20c   :  { %515 = vmatmul.mubr.bf16.vlgmr.msra.gmra.mrb[4].mxu0 %v293_v42 }
 0x2df   :  { %v380_v44 = vpop.f32.mrb[4].mxu0 }
 0x2e0   :  { %v381_v45 = vadd.f32 %v422_v43, %v380_v44  ;;  %v516_v46 = vpop.f32.mrb[5].mxu0 }
 0x2e1   :  { %v383_v47 = vpop.f32.mrb[6].mxu0 }
 0x2e2   :  { %550 = vtanh.f32 %v381_v45  ;;  %v517_v48 = vpop.f32.mrb[7].mxu0 }
 0x2ec   :  { %v551_v49 = vpop.eup %550 }
 0x2ed   :  { %387 = vst [vmem:[#allocation8] sm:$0xff] %v551_v49 }
 0x2ee   :  { %629 = shalt.err (!%p626_p0)
}
 0x2ef   :  { %s630_s25 = scalar_lea.hbm %s755_s3, 128 }
 0x2f0   :  { %p631_p1 = scmp.ne.s32.totalorder %s755_s3, %s630_s25  ;;  %p634_p2 = scmp.lt.u32.totalorder %s630_s25, %s755_s3 }
 0x2f2   :  { %p636_p3 = pnand %p634_p2, %p631_p1 }
 0x2f4   :  { %639 = shalt.err (!%p636_p3)
}
 0x2f5   :  { %397 = dma.vmem_to_hbm [thread:$0]  %s395_s21, 128, %s755_s3, [#allocation4]  }
 0x2f6   :  { %644 = dma.done.wait [#allocation4], 128  }
 0x2f7   :  { %645 = vsyncadd [#allocation4], 4294967168 }
 0x2f8   :  { %401 = vsyncpa [#allocation3], 1 }
 0x2f9   :  { %402 = vsyncpa [#allocation6], 1 }
 0x2fa   :  { %403 = vsyncpa [#allocation4], 1 }

// kernel: fwd.1
= control target key start
LH: loop header
LB: loop body
LE: loop exit
PB: predicated region body
PF: predicated region fallthrough
CT: control target
= control target key end

     0   :  { %8 = vsyncpa [#allocation3], 0  ;;  %s752_s0 = inlined_call_operand.hbm [shape: f32[8,128], index: 0, kind: input, shape index: {}]   ;;  %s753_s1 = inlined_call_operand.hbm [shape: bf16[384,128], index: 1, kind: input, shape index: {}]   ;;  %s754_s2 = inlined_call_operand.hbm [shape: f32[8,128], index: 2, kind: input, shape index: {}]   ;;  %s755_s3 = inlined_call_operand.hbm [shape: f32[8,128], index: 3, kind: output, shape index: {}]  }
   0x1   :  { %9 = vsyncpa [#allocation6], 0 }
   0x2   :  { %10 = vsyncpa [#allocation4], 0  ;;  %s646_s12 = smov [#allocation5]   ;;  %s552_s16 = scalar_lea.hbm %s753_s1, 3072 }
   0x3   :  { %s26_s13 = sshll.u32 %s646_s12, 4  ;;  %p553_p0 = scmp.ne.s32.totalorder %s753_s1, %s552_s16  ;;  %s27_s13 = int_to_ptr.vmem [resolvable:$true] %s26_s13 }
   0x4   :  { %p556_p1 = scmp.lt.u32.totalorder %s552_s16, %s753_s1 }
   0x6   :  { %p558_p2 = pnand %p556_p1, %p553_p0 }
   0x8   :  { %561 = shalt.err (!%p558_p2)
}
   0x9   :  { %s562_s21 = scalar_lea.vmem %s27_s13, 3072  ;;  %p567_p4 = scmp.lt.s32.totalorder %s27_s13, %s27_s13 }
   0xa   :  { %p563_p3 = scmp.ne.s32.totalorder %s27_s13, %s562_s21  ;;  %p568_p5 = scmp.lt.s32.totalorder %s562_s21, %s562_s21 }
   0xc   :  { %p569_p6 = por %p568_p5, %p567_p4 }
   0xe   :  { %p570_p7 = pnand %p569_p6, %p563_p3 }
  0x10   :  { %573 = shalt.err (!%p570_p7)
}
  0x11   :  { %s647_s22 = smov 64   ;;  %s648_s23 = smov 4  }
  0x12   :  { %32 = dma.hbm_to_vmem [thread:$0]  %s753_s1, 3072, %s27_s13, [#allocation6], %s647_s22, %s647_s22, %s648_s23  }
  0x13   :  { %s649_s26 = smov [#allocation2]   ;;  %s650_s28 = smov [#allocation7]  }
  0x14   :  { %s17_s27 = sshll.u32 %s649_s26, 4  ;;  %s39_s29 = sshll.u32 %s650_s28, 4  ;;  %s18_s27 = int_to_ptr.vmem [resolvable:$true] %s17_s27  ;;  %s40_s29 = int_to_ptr.vmem [resolvable:$true] %s39_s29 }
  0x15   :  { %s574_s5 = scalar_lea.hbm %s752_s0, 128 }
  0x16   :  { %p575_p8 = scmp.ne.s32.totalorder %s752_s0, %s574_s5  ;;  %p578_p9 = scmp.lt.u32.totalorder %s574_s5, %s752_s0 }
  0x18   :  { %p580_p10 = pnand %p578_p9, %p575_p8 }
  0x1a   :  { %583 = shalt.err (!%p580_p10)
}
  0x1b   :  { %s584_s1 = scalar_lea.vmem %s18_s27, 128  ;;  %p589_p12 = scmp.lt.s32.totalorder %s18_s27, %s18_s27 }
  0x1c   :  { %p585_p11 = scmp.ne.s32.totalorder %s18_s27, %s584_s1  ;;  %p590_p13 = scmp.lt.s32.totalorder %s584_s1, %s584_s1 }
  0x1e   :  { %p591_p0 = por %p590_p13, %p589_p12 }
  0x20   :  { %p592_p1 = pnand %p591_p0, %p585_p11 }
  0x22   :  { %595 = shalt.err (!%p592_p1)
}
  0x23   :  { %20 = dma.hbm_to_vmem [thread:$0]  %s752_s0, 128, %s18_s27, [#allocation3]  }
  0x24   :  { %s596_s14 = scalar_lea.hbm %s754_s2, 128 }
  0x25   :  { %p597_p2 = scmp.ne.s32.totalorder %s754_s2, %s596_s14  ;;  %p600_p3 = scmp.lt.u32.totalorder %s596_s14, %s754_s2 }
  0x27   :  { %p602_p4 = pnand %p600_p3, %p597_p2 }
  0x29   :  { %605 = shalt.err (!%p602_p4)
}
  0x2a   :  { %s606_s19 = scalar_lea.vmem %s40_s29, 128  ;;  %p611_p6 = scmp.lt.s32.totalorder %s40_s29, %s40_s29 }
  0x2b   :  { %p607_p5 = scmp.ne.s32.totalorder %s40_s29, %s606_s19  ;;  %p612_p7 = scmp.lt.s32.totalorder %s606_s19, %s606_s19 }
  0x2d   :  { %p613_p8 = por %p612_p7, %p611_p6 }
  0x2f   :  { %p614_p9 = pnand %p613_p8, %p607_p5 }
  0x31   :  { %617 = shalt.err (!%p614_p9)
}
  0x32   :  { %42 = dma.hbm_to_vmem [thread:$0]  %s754_s2, 128, %s40_s29, [#allocation6]  }
  0x33   :  { %640 = dma.done.wait [#allocation3], 128  }
  0x34   :  { %641 = vsyncadd [#allocation3], 4294967168 }
  0x35   :  { %642 = dma.done.wait [#allocation6], 3200  }
  0x36   :  { %643 = vsyncadd [#allocation6], 4294964096  ;;  %v651_v0 = vmov 0.0   ;;  %vm652_vm0 = vmmov 0   ;;  %v526_v1 = vld [vmem:[#allocation5] sm:$0xff]   ;;  %v527_v2 = vld [vmem:[#allocation5 + $0x8] sm:$0xff]  }
  0x37   :  { %458 = vmatprep.subr.bf16.mxu0 %v651_v0  ;;  %474 = vmatprep.mubr.msk.bf16.mxu0 %vm652_vm0, %v651_v0  ;;  %v528_v3 = vld [vmem:[#allocation5 + $0x10] sm:$0xff]   ;;  %v534_v4 = vld [vmem:[#allocation5 + $0x40] sm:$0xff]   ;;  %v529_v5 = vld [vmem:[#allocation5 + $0x18] sm:$0xff]   ;;  %s653_s2 = smov [#allocation8]  }
  0x38   :  { %478 = vmatprep.subr.bf16.mxu1 %v651_v0  ;;  %494 = vmatprep.mubr.msk.bf16.mxu1 %vm652_vm0, %v651_v0  ;;  %v535_v6 = vld [vmem:[#allocation5 + $0x48] sm:$0xff]   ;;  %v530_v7 = vld [vmem:[#allocation5 + $0x20] sm:$0xff]   ;;  %v536_v8 = vld [vmem:[#allocation5 + $0x50] sm:$0xff]   ;;  %s394_s21 = sshll.u32 %s653_s2, 4  ;;  %s395_s21 = int_to_ptr.vmem [resolvable:$true] %s394_s21 }
  0x39   :  { %459 = vmatpush3.bf16.msra.mxu0 %v526_v1  ;;  %479 = vmatpush3.bf16.msra.mxu1 %v534_v4  ;;  %v531_v9 = vld [vmem:[#allocation5 + $0x28] sm:$0xff]   ;;  %v537_v10 = vld [vmem:[#allocation5 + $0x58] sm:$0xff]   ;;  %v532_v11 = vld [vmem:[#allocation5 + $0x30] sm:$0xff]   ;;  %s618_s22 = scalar_lea.vmem %s395_s21, 128  ;;  %p623_p11 = scmp.lt.s32.totalorder %s395_s21, %s395_s21 }
  0x3a   :  { %460 = vmatprep.subr.bf16.mxu0 %v651_v0  ;;  %480 = vmatprep.subr.bf16.mxu1 %v651_v0  ;;  %v538_v12 = vld [vmem:[#allocation5 + $0x60] sm:$0xff]   ;;  %v533_v13 = vld [vmem:[#allocation5 + $0x38] sm:$0xff]   ;;  %v539_v15 = vld [vmem:[#allocation5 + $0x68] sm:$0xff]   ;;  %p619_p10 = scmp.ne.s32.totalorder %s395_s21, %s618_s22  ;;  %p624_p12 = scmp.lt.s32.totalorder %s618_s22, %s618_s22 }
  0x3b   :  { %v53_v14 = vld [vmem:[#allocation2] sm:$0xff]  ;;  %v540_v17 = vld [vmem:[#allocation5 + $0x70] sm:$0xff]   ;;  %v542_v19 = vld [vmem:[#allocation5 + $0x80] sm:$0xff]  }
  0x3c   :  { %v71_v16 = vpack.c.bf16 %v53_v14, %v53_v14  ;;  %v541_v18 = vld [vmem:[#allocation5 + $0x78] sm:$0xff]   ;;  %v543_v20 = vld [vmem:[#allocation5 + $0x88] sm:$0xff]   ;;  %v544_v21 = vld [vmem:[#allocation5 + $0x90] sm:$0xff]   ;;  %p625_p13 = por %p624_p12, %p623_p11 }
  0x3d   :  { %461 = vmatpush3.bf16.msra.mxu0 %v527_v2  ;;  %481 = vmatpush3.bf16.msra.mxu1 %v535_v6  ;;  %v545_v22 = vld [vmem:[#allocation5 + $0x98] sm:$0xff]   ;;  %v546_v23 = vld [vmem:[#allocation5 + $0xa0] sm:$0xff]   ;;  %v547_v24 = vld [vmem:[#allocation5 + $0xa8] sm:$0xff]  }
  0x3e   :  { %462 = vmatprep.subr.bf16.mxu0 %v651_v0  ;;  %482 = vmatprep.subr.bf16.mxu1 %v651_v0  ;;  %v404_v25 = vld [vmem:[#allocation7] ss:$0 sm:$0xff]  ;;  %v548_v33 = vld [vmem:[#allocation5 + $0xb0] sm:$0xff]   ;;  %v549_v34 = vld [vmem:[#allocation5 + $0xb8] sm:$0xff]   ;;  %p626_p0 = pnand %p625_p13, %p619_p10 }
  0x3f   :  { %v413_v35 = vld [vmem:[#allocation7 + $0x1] ss:$0 sm:$0xff]  ;;  %v422_v43 = vld [vmem:[#allocation7 + $0x2] ss:$0 sm:$0xff] }
  0x41   :  { %463 = vmatpush3.bf16.msra.mxu0 %v528_v3  ;;  %483 = vmatpush3.bf16.msra.mxu1 %v536_v8 }
  0x42   :  { %464 = vmatprep.subr.bf16.mxu0 %v651_v0  ;;  %484 = vmatprep.subr.bf16.mxu1 %v651_v0 }
  0x45   :  { %465 = vmatpush3.bf16.msra.mxu0 %v529_v5  ;;  %485 = vmatpush3.bf16.msra.mxu1 %v537_v10 }
  0x46   :  { %466 = vmatprep.subr.bf16.mxu0 %v651_v0  ;;  %486 = vmatprep.subr.bf16.mxu1 %v651_v0 }
  0x49   :  { %467 = vmatpush3.bf16.msra.mxu0 %v530_v7  ;;  %487 = vmatpush3.bf16.msra.mxu1 %v538_v12 }
  0x4a   :  { %468 = vmatprep.subr.bf16.mxu0 %v651_v0  ;;  %488 = vmatprep.subr.bf16.mxu1 %v651_v0 }
  0x4d   :  { %469 = vmatpush3.bf16.msra.mxu0 %v531_v9  ;;  %489 = vmatpush3.bf16.msra.mxu1 %v539_v15 }
  0x4e   :  { %470 = vmatprep.subr.bf16.mxu0 %v651_v0  ;;  %490 = vmatprep.subr.bf16.mxu1 %v651_v0 }
  0x51   :  { %471 = vmatpush3.bf16.msra.mxu0 %v532_v11  ;;  %491 = vmatpush3.bf16.msra.mxu1 %v540_v17 }
  0x52   :  { %472 = vmatprep.subr.bf16.mxu0 %v651_v0  ;;  %492 = vmatprep.subr.bf16.mxu1 %v651_v0 }
  0x55   :  { %473 = vmatpush3.bf16.msra.mxu0 %v533_v13  ;;  %493 = vmatpush3.bf16.msra.mxu1 %v541_v18 }
  0x56   :  { %498 = vmatprep.subr.bf16.mxu0 %v651_v0 }
  0x58   :  { %475 = vmatmul.mubr.bf16.vlgmr.msra.gmra.mrb[0].mxu0 %v71_v16 }
  0x59   :  { %514 = vmatprep.mubr.msk.bf16.mxu0 %vm652_vm0, %v651_v0  ;;  %499 = vmatpush3.bf16.msra.mxu0 %v542_v19 }
  0x5a   :  { %500 = vmatprep.subr.bf16.mxu0 %v651_v0 }
  0x5d   :  { %501 = vmatpush3.bf16.msra.mxu0 %v543_v20 }
  0x5e   :  { %502 = vmatprep.subr.bf16.mxu0 %v651_v0 }
  0x61   :  { %503 = vmatpush3.bf16.msra.mxu0 %v544_v21 }
  0x62   :  { %504 = vmatprep.subr.bf16.mxu0 %v651_v0 }
  0x65   :  { %505 = vmatpush3.bf16.msra.mxu0 %v545_v22 }
  0x66   :  { %506 = vmatprep.subr.bf16.mxu0 %v651_v0 }
  0x69   :  { %507 = vmatpush3.bf16.msra.mxu0 %v546_v23 }
  0x6a   :  { %508 = vmatprep.subr.bf16.mxu0 %v651_v0 }
  0x6d   :  { %509 = vmatpush3.bf16.msra.mxu0 %v547_v24 }
  0x6e   :  { %510 = vmatprep.subr.bf16.mxu0 %v651_v0 }
  0x71   :  { %511 = vmatpush3.bf16.msra.mxu0 %v548_v33 }
  0x72   :  { %512 = vmatprep.subr.bf16.mxu0 %v651_v0 }
  0x75   :  { %513 = vmatpush3.bf16.msra.mxu0 %v549_v34 }
 0x12b   :  { %v158_v26 = vpop.f32.mrb[0].mxu0 }
 0x12c   :  { %v159_v27 = vadd.f32 %v404_v25, %v158_v26  ;;  %v476_v28 = vpop.f32.mrb[1].mxu0 }
 0x12d   :  { %v161_v29 = vpop.f32.mrb[2].mxu0 }
 0x12e   :  { %v164_v30 = vmax.f32 %v159_v27, 0.0  ;;  %v477_v31 = vpop.f32.mrb[3].mxu0 }
 0x130   :  { %v182_v32 = vpack.c.bf16 %v164_v30, %v164_v30 }
 0x132   :  { %495 = vmatmul.mubr.bf16.vlgmr.msra.gmra.mrb[0].mxu1 %v182_v32 }
 0x205   :  { %v269_v36 = vpop.f32.mrb[0].mxu1 }
 0x206   :  { %v270_v37 = vadd.f32 %v413_v35, %v269_v36  ;;  %v496_v38 = vpop.f32.mrb[1].mxu1 }
 0x207   :  { %v272_v39 = vpop.f32.mrb[2].mxu1 }
 0x208   :  { %v275_v40 = vmax.f32 %v270_v37, 0.0  ;;  %v497_v41 = vpop.f32.mrb[3].mxu1 }
 0x20a   :  { %v293_v42 = vpack.c.bf16 %v275_v40, %v275_v40 }
 0x20c   :  { %515 = vmatmul.mubr.bf16.vlgmr.msra.gmra.mrb[4].mxu0 %v293_v42 }
 0x2df   :  { %v380_v44 = vpop.f32.mrb[4].mxu0 }
 0x2e0   :  { %v381_v45 = vadd.f32 %v422_v43, %v380_v44  ;;  %v516_v46 = vpop.f32.mrb[5].mxu0 }
 0x2e1   :  { %v383_v47 = vpop.f32.mrb[6].mxu0 }
 0x2e2   :  { %550 = vtanh.f32 %v381_v45  ;;  %v517_v48 = vpop.f32.mrb[7].mxu0 }
 0x2ec   :  { %v551_v49 = vpop.eup %550 }
 0x2ed   :  { %387 = vst [vmem:[#allocation8] sm:$0xff] %v551_v49 }
 0x2ee   :  { %629 = shalt.err (!%p626_p0)
}
 0x2ef   :  { %s630_s25 = scalar_lea.hbm %s755_s3, 128 }
 0x2f0   :  { %p631_p1 = scmp.ne.s32.totalorder %s755_s3, %s630_s25  ;;  %p634_p2 = scmp.lt.u32.totalorder %s630_s25, %s755_s3 }
 0x2f2   :  { %p636_p3 = pnand %p634_p2, %p631_p1 }
 0x2f4   :  { %639 = shalt.err (!%p636_p3)
}
 0x2f5   :  { %397 = dma.vmem_to_hbm [thread:$0]  %s395_s21, 128, %s755_s3, [#allocation4]  }
 0x2f6   :  { %644 = dma.done.wait [#allocation4], 128  }
 0x2f7   :  { %645 = vsyncadd [#allocation4], 4294967168 }
 0x2f8   :  { %401 = vsyncpa [#allocation3], 1 }
 0x2f9   :  { %402 = vsyncpa [#allocation6], 1 }
 0x2fa   :  { %403 = vsyncpa [#allocation4], 1 }

</bundles_post_ra>
